<compile_context>
chip_gen: v6e
topology: v6e:2x2x1
jax: 0.10.0
libtpu: 0.0.40
codegen_flags: <defaults>
</compile_context>

<pallas_src>
import jax
import jax.numpy as jnp
from jax.experimental import pallas as pl
from jax.experimental.pallas import tpu as pltpu

LANE = 128      # vreg lane width
SUBLANE = 8     # vreg sublane count (f32)


def _round_up(n, m):
    return (n + m - 1) // m * m


def tabular_mlp_kernel(x_ref, w1_ref, b1_ref, w2_ref, b2_ref, wc_ref, bc_ref, out_ref):
    # Encoder layer 1: Linear + ReLU. Cast f32 input rows to bf16 at the MXU boundary.
    x = x_ref[...].astype(w1_ref.dtype)
    h = jnp.dot(x, w1_ref[...], preferred_element_type=jnp.float32)
    h = jnp.maximum(h + b1_ref[...], 0.0).astype(w2_ref.dtype)     # bf16 intermediate
    # Encoder layer 2: Linear + ReLU -> embedding.
    e = jnp.dot(h, w2_ref[...], preferred_element_type=jnp.float32)
    e = jnp.maximum(e + b2_ref[...], 0.0).astype(wc_ref.dtype)     # bf16 intermediate
    # Classifier: Linear -> logits, stored unpadded (only the C real lanes reach HBM).
    logits = jnp.dot(e, wc_ref[...], preferred_element_type=jnp.float32)
    out_ref[...] = logits + bc_ref[...]


def prepare_params(params):
    """One-time kernel-side weight prep (hoisted out of the forward pass):
    bf16 MXU weights, f32 (1, dim) bias rows. Call once, reuse for every forward."""
    bf16, f32 = jnp.bfloat16, jnp.float32
    return {
        "w1": jnp.asarray(params["w1"], bf16),
        "b1": jnp.asarray(params["b1"], f32).reshape(1, -1),
        "w2": jnp.asarray(params["w2"], bf16),
        "b2": jnp.asarray(params["b2"], f32).reshape(1, -1),
        "wc": jnp.asarray(params["wc"], bf16),
        "bc": jnp.asarray(params["bc"], f32).reshape(1, -1),
    }


def tabular_model_forward(x, kparams, *, block_rows=2048, min_grid_steps=2):
    """x: (B, F) float32; kparams: output of prepare_params. Returns (B, num_classes) f32."""
    w1, b1 = kparams["w1"], kparams["b1"]
    w2, b2 = kparams["w2"], kparams["b2"]
    wc, bc = kparams["wc"], kparams["bc"]

    B, F = x.shape
    H = w1.shape[1]
    E = w2.shape[1]
    C = wc.shape[1]

    # Batch tile: as large as block_rows allows (each grid step costs ~0.35 us of fixed
    # overhead), but capped so the grid has >= min_grid_steps steps (keeps the second
    # TensorCore busy on v7x) and never exceeds the sublane-rounded batch. Multiple of 8.
    TB = min(block_rows, _round_up(pl.cdiv(B, max(min_grid_steps, 1)), SUBLANE))
    TB = max(SUBLANE, min(TB, _round_up(B, SUBLANE)))
    # Partial last block: OOB input rows hold unspecified data but every row is independent
    # and OOB output rows are discarded by Pallas, so this is numerically safe.
    grid = (pl.cdiv(B, TB),)

    # Weights / biases: constant index_map -> resident across the whole grid.
    def resident(shape):
        return pl.BlockSpec(shape, lambda i: (0, 0))

    # VMEM budget for the chosen tile (lane-padded to 128 in VMEM), with 2x headroom.
    lp = lambda n: _round_up(max(n, 1), LANE)
    bytes_per_step = (
        2 * TB * lp(F) * 4                                   # x tile (f32, double-buffered)
        + 2 * TB * lp(C) * 4                                 # logits tile (f32, double-buffered)
        + TB * lp(H) * (4 + 2)                               # h: f32 accum + bf16 copy
        + TB * lp(E) * (4 + 2)                               # e: f32 accum + bf16 copy
        + 2 * 2 * (F * lp(H) + H * lp(E) + E * lp(C))        # bf16 weights (double-buffered)
        + 2 * 4 * (lp(H) + lp(E) + lp(C))                    # f32 biases (double-buffered)
    )
    # Floor at the largest default scoped limit (32 MiB), cap safely under v7x's 64 MiB.
    vmem_limit = int(min(max(2 * bytes_per_step, 32 * 2**20), 48 * 2**20))

    flops = 2 * B * (F * H + H * E + E * C)
    bytes_accessed = (
        4 * B * F                          # f32 x stream (unpadded)
        + 4 * B * C                        # f32 logits stream (unpadded)
        + 2 * (F * H + H * E + E * C)      # bf16 weights (resident, read once)
        + 4 * (H + E + C)                  # f32 biases
    )

    return pl.pallas_call(
        tabular_mlp_kernel,
        out_shape=jax.ShapeDtypeStruct((B, C), jnp.float32),
        grid=grid,
        in_specs=[
            pl.BlockSpec((TB, F), lambda i: (i, 0)),   # x: tiled over batch rows, full F
            resident((F, H)),
            resident((1, H)),
            resident((H, E)),
            resident((1, E)),
            resident((E, C)),
            resident((1, C)),
        ],
        out_specs=pl.BlockSpec((TB, C), lambda i: (i, 0)),  # unpadded class dim
        compiler_params=pltpu.CompilerParams(
            dimension_semantics=("parallel",),               # megacore / 2-TC sharding on v7x
            vmem_limit_bytes=vmem_limit,
        ),
        cost_estimate=pl.CostEstimate(
            flops=flops, transcendentals=0, bytes_accessed=bytes_accessed),
    )(x, w1, b1, w2, b2, wc, bc)


def init_params(key, input_dim, hidden_dim, embedding_dim, num_classes):
    k1, k2, k3, k4, k5, k6 = jax.random.split(key, 6)
    scale = 0.1
    return {
        "w1": scale * jax.random.normal(k1, (input_dim, hidden_dim), jnp.float32),
        "b1": scale * jax.random.normal(k2, (1, hidden_dim), jnp.float32),
        "w2": scale * jax.random.normal(k3, (hidden_dim, embedding_dim), jnp.float32),
        "b2": scale * jax.random.normal(k4, (1, embedding_dim), jnp.float32),
        "wc": scale * jax.random.normal(k5, (embedding_dim, num_classes), jnp.float32),
        "bc": scale * jax.random.normal(k6, (1, num_classes), jnp.float32),
    }


def reference_forward(x, p):
    h = jnp.maximum(x @ p["w1"] + p["b1"], 0.0)
    e = jnp.maximum(h @ p["w2"] + p["b2"], 0.0)
    return e @ p["wc"] + p["bc"]


if __name__ == "__main__":
    key = jax.random.PRNGKey(0)
    kx, kp, kx2 = jax.random.split(key, 3)

    batch = 8
    input_dim = 32       # number of tabular features
    hidden_dim = 64
    embedding_dim = 32   # args.embedding_dim
    num_classes = 10     # args.num_classes

    x = jax.random.normal(kx, (batch, input_dim), jnp.float32)
    params = init_params(kp, input_dim, hidden_dim, embedding_dim, num_classes)
    kparams = prepare_params(params)     # one-time weight cast/reshape, hoisted out of forward

    out = jax.block_until_ready(tabular_model_forward(x, kparams))
    ref = reference_forward(x, params)
    assert out.shape == (batch, num_classes)
    # bf16 MXU operands with f32 accumulation -> loose tolerance vs. pure-f32 reference.
    assert jnp.allclose(out, ref, atol=5e-2, rtol=5e-2)

    # Multi-step grid with a clipped partial last batch block (B=24 -> TB=16, grid=2).
    x2 = jax.random.normal(kx2, (24, input_dim), jnp.float32)
    out2 = jax.block_until_ready(tabular_model_forward(x2, kparams))
    ref2 = reference_forward(x2, params)
    assert out2.shape == (24, num_classes)
    assert jnp.allclose(out2, ref2, atol=5e-2, rtol=5e-2)

    # Small explicit tile: 3 full grid steps (exercises the multi-tile path without padding).
    out3 = jax.block_until_ready(tabular_model_forward(x2, kparams, block_rows=8))
    assert jnp.allclose(out3, ref2, atol=5e-2, rtol=5e-2)

    print("KERNEL_OK")
</pallas_src>

<mosaic_0001>
module attributes {stable_mosaic.version = 11 : i64} {
  func.func @tabular_mlp_kernel(%arg0: i32, %arg1: memref<8x32xf32, #tpu.memory_space<vmem>>, %arg2: memref<32x64xbf16, #tpu.memory_space<vmem>>, %arg3: memref<1x64xf32, #tpu.memory_space<vmem>>, %arg4: memref<64x32xbf16, #tpu.memory_space<vmem>>, %arg5: memref<1x32xf32, #tpu.memory_space<vmem>>, %arg6: memref<32x10xbf16, #tpu.memory_space<vmem>>, %arg7: memref<1x10xf32, #tpu.memory_space<vmem>>, %arg8: memref<8x10xf32, #tpu.memory_space<vmem>>) attributes {dimension_semantics = [#tpu.dimension_semantics<parallel>], iteration_bounds = array<i64: 1>, scalar_prefetch = 0 : i64, scratch_operands = 0 : i64, tpu.core_type = #tpu.core_type<tc>, window_params = [{transform_indices = @transform_0, window_bounds = array<i64: 8, 32>}, {pipeline_mode = #tpu.pipeline_mode<synchronous>, transform_indices = @transform_1, window_bounds = array<i64: 32, 64>}, {pipeline_mode = #tpu.pipeline_mode<synchronous>, transform_indices = @transform_2, window_bounds = array<i64: 1, 64>}, {pipeline_mode = #tpu.pipeline_mode<synchronous>, transform_indices = @transform_3, window_bounds = array<i64: 64, 32>}, {pipeline_mode = #tpu.pipeline_mode<synchronous>, transform_indices = @transform_4, window_bounds = array<i64: 1, 32>}, {pipeline_mode = #tpu.pipeline_mode<synchronous>, transform_indices = @transform_5, window_bounds = array<i64: 32, 10>}, {pipeline_mode = #tpu.pipeline_mode<synchronous>, transform_indices = @transform_6, window_bounds = array<i64: 1, 10>}, {transform_indices = @transform_7, window_bounds = array<i64: 8, 10>}]} {
    %c0 = arith.constant 0 : index
    %c0_0 = arith.constant 0 : index
    %0 = vector.load %arg1[%c0, %c0_0] : memref<8x32xf32, #tpu.memory_space<vmem>>, vector<8x32xf32>
    %1 = arith.truncf %0 : vector<8x32xf32> to vector<8x32xbf16>
    %c0_1 = arith.constant 0 : index
    %c0_2 = arith.constant 0 : index
    %2 = vector.load %arg2[%c0_1, %c0_2] : memref<32x64xbf16, #tpu.memory_space<vmem>>, vector<32x64xbf16>
    %cst = arith.constant dense<0.000000e+00> : vector<8x64xf32>
    %3 = tpu.matmul %1, %2, %cst {dimension_numbers = #tpu.dot_dimension_numbers<[1], [0], [0], [1], [0, 0, 1, 1], [], []>} : vector<8x32xbf16>, vector<32x64xbf16>, vector<8x64xf32> -> vector<8x64xf32>
    %c0_3 = arith.constant 0 : index
    %c0_4 = arith.constant 0 : index
    %4 = vector.load %arg3[%c0_3, %c0_4] : memref<1x64xf32, #tpu.memory_space<vmem>>, vector<1x64xf32>
    %5 = vector.broadcast %4 : vector<1x64xf32> to vector<8x64xf32>
    %6 = arith.addf %3, %5 : vector<8x64xf32>
    %cst_5 = arith.constant 0.000000e+00 : f32
    %7 = vector.broadcast %cst_5 : f32 to vector<8x64xf32>
    %8 = arith.maximumf %6, %7 : vector<8x64xf32>
    %9 = arith.truncf %8 : vector<8x64xf32> to vector<8x64xbf16>
    %c0_6 = arith.constant 0 : index
    %c0_7 = arith.constant 0 : index
    %10 = vector.load %arg4[%c0_6, %c0_7] : memref<64x32xbf16, #tpu.memory_space<vmem>>, vector<64x32xbf16>
    %cst_8 = arith.constant dense<0.000000e+00> : vector<8x32xf32>
    %11 = tpu.matmul %9, %10, %cst_8 {dimension_numbers = #tpu.dot_dimension_numbers<[1], [0], [0], [1], [0, 0, 1, 1], [], []>} : vector<8x64xbf16>, vector<64x32xbf16>, vector<8x32xf32> -> vector<8x32xf32>
    %c0_9 = arith.constant 0 : index
    %c0_10 = arith.constant 0 : index
    %12 = vector.load %arg5[%c0_9, %c0_10] : memref<1x32xf32, #tpu.memory_space<vmem>>, vector<1x32xf32>
    %13 = vector.broadcast %12 : vector<1x32xf32> to vector<8x32xf32>
    %14 = arith.addf %11, %13 : vector<8x32xf32>
    %cst_11 = arith.constant 0.000000e+00 : f32
    %15 = vector.broadcast %cst_11 : f32 to vector<8x32xf32>
    %16 = arith.maximumf %14, %15 : vector<8x32xf32>
    %17 = arith.truncf %16 : vector<8x32xf32> to vector<8x32xbf16>
    %c0_12 = arith.constant 0 : index
    %c0_13 = arith.constant 0 : index
    %18 = vector.load %arg6[%c0_12, %c0_13] : memref<32x10xbf16, #tpu.memory_space<vmem>>, vector<32x10xbf16>
    %cst_14 = arith.constant dense<0.000000e+00> : vector<8x10xf32>
    %19 = tpu.matmul %17, %18, %cst_14 {dimension_numbers = #tpu.dot_dimension_numbers<[1], [0], [0], [1], [0, 0, 1, 1], [], []>} : vector<8x32xbf16>, vector<32x10xbf16>, vector<8x10xf32> -> vector<8x10xf32>
    %c0_15 = arith.constant 0 : index
    %c0_16 = arith.constant 0 : index
    %20 = vector.load %arg7[%c0_15, %c0_16] : memref<1x10xf32, #tpu.memory_space<vmem>>, vector<1x10xf32>
    %21 = vector.broadcast %20 : vector<1x10xf32> to vector<8x10xf32>
    %22 = arith.addf %19, %21 : vector<8x10xf32>
    %c0_17 = arith.constant 0 : index
    %c0_18 = arith.constant 0 : index
    %23 = vector.load %arg8[%c0_17, %c0_18] : memref<8x10xf32, #tpu.memory_space<vmem>>, vector<8x10xf32>
    tpu.vector_store %arg8[%c0_17, %c0_18], %22 {strides = array<i32>} : memref<8x10xf32, #tpu.memory_space<vmem>>, vector<8x10xf32>,
    return
  }
  func.func @transform_0(%arg0: i32) -> (i32, i32) {
    %c0_i32 = arith.constant 0 : i32
    %c0_i32_0 = arith.constant 0 : i32
    return %arg0, %c0_i32 : i32, i32
  }
  func.func @transform_1(%arg0: i32) -> (i32, i32) {
    %c0_i32 = arith.constant 0 : i32
    %c0_i32_0 = arith.constant 0 : i32
    %c0_i32_1 = arith.constant 0 : i32
    return %c0_i32, %c0_i32_0 : i32, i32
  }
  func.func @transform_2(%arg0: i32) -> (i32, i32) {
    %c0_i32 = arith.constant 0 : i32
    %c0_i32_0 = arith.constant 0 : i32
    %c0_i32_1 = arith.constant 0 : i32
    return %c0_i32, %c0_i32_0 : i32, i32
  }
  func.func @transform_3(%arg0: i32) -> (i32, i32) {
    %c0_i32 = arith.constant 0 : i32
    %c0_i32_0 = arith.constant 0 : i32
    %c0_i32_1 = arith.constant 0 : i32
    return %c0_i32, %c0_i32_0 : i32, i32
  }
  func.func @transform_4(%arg0: i32) -> (i32, i32) {
    %c0_i32 = arith.constant 0 : i32
    %c0_i32_0 = arith.constant 0 : i32
    %c0_i32_1 = arith.constant 0 : i32
    return %c0_i32, %c0_i32_0 : i32, i32
  }
  func.func @transform_5(%arg0: i32) -> (i32, i32) {
    %c0_i32 = arith.constant 0 : i32
    %c0_i32_0 = arith.constant 0 : i32
    %c0_i32_1 = arith.constant 0 : i32
    return %c0_i32, %c0_i32_0 : i32, i32
  }
  func.func @transform_6(%arg0: i32) -> (i32, i32) {
    %c0_i32 = arith.constant 0 : i32
    %c0_i32_0 = arith.constant 0 : i32
    %c0_i32_1 = arith.constant 0 : i32
    return %c0_i32, %c0_i32_0 : i32, i32
  }
  func.func @transform_7(%arg0: i32) -> (i32, i32) {
    %c0_i32 = arith.constant 0 : i32
    %c0_i32_0 = arith.constant 0 : i32
    return %arg0, %c0_i32 : i32, i32
  }
}

</mosaic_0001>

<bundles_post_ra>
// kernel: tpu_custom_call.1
= control target key start
LH: loop header
LB: loop body
LE: loop exit
PB: predicated region body
PF: predicated region fallthrough
CT: control target
= control target key end

     0   :  { %v352_v1 = vmov 0.0   ;;  %vm353_vm0 = vmmov 0   ;;  %vm53_vm1 = vcmask 261120   ;;  %s439_s0 = inlined_call_operand.vmem [shape: f32[8,32], index: 0, kind: input, shape index: {}]   ;;  %s440_s1 = inlined_call_operand.vmem [shape: bf16[32,64], index: 1, kind: input, shape index: {}]   ;;  %s441_s2 = inlined_call_operand.vmem [shape: f32[1,64], index: 2, kind: input, shape index: {}]   ;;  %s442_s3 = inlined_call_operand.vmem [shape: bf16[64,32], index: 3, kind: input, shape index: {}]   ;;  %s443_s4 = inlined_call_operand.vmem [shape: f32[1,32], index: 4, kind: input, shape index: {}]   ;;  %s444_s5 = inlined_call_operand.vmem [shape: bf16[32,10], index: 5, kind: input, shape index: {}]   ;;  %s445_s6 = inlined_call_operand.vmem [shape: f32[1,10], index: 6, kind: input, shape index: {}]   ;;  %s446_s7 = inlined_call_operand.hbm [shape: f32[8,10], index: 7, kind: output, shape index: {}]  }
   0x1   :  { %v322_v0 = vld [vmem:[%s440_s1 + $0x8] sm:$0xff]   ;;  %291 = vmatprep.subr.bf16.mxu0 %v352_v1  ;;  %v323_v2 = vld [vmem:[%s440_s1] sm:$0xff]   ;;  %299 = vmatprep.subr.bf16.mxu1 %v352_v1  ;;  %v324_v4 = vld [vmem:[%s442_s3 + $0x18] sm:$0xff]  }
   0x2   :  { %292 = vmatpush3.bf16.msra.mxu0 %v322_v0  ;;  %295 = vmatprep.mubr.msk.bf16.mxu0 %vm353_vm0, %v352_v1  ;;  %v28_v3 = vld [vmem:[%s439_s0] sm:$0xff]  ;;  %v325_v5 = vld [vmem:[%s442_s3 + $0x10] sm:$0xff]  }
   0x3   :  { %293 = vmatprep.subr.bf16.mxu0 %v352_v1  ;;  %307 = vmatprep.mubr.msk.bf16.mxu1 %vm353_vm0, %v352_v1  ;;  %v29_v6 = vpack.c.bf16 %v28_v3, %v28_v3 }
   0x4   :  { %300 = vmatpush3.bf16.msra.mxu1 %v324_v4 }
   0x5   :  { %301 = vmatprep.subr.bf16.mxu1 %v352_v1 }
   0x6   :  { %294 = vmatpush3.bf16.msra.mxu0 %v323_v2 }
   0x7   :  { %311 = vmatprep.subr.bf16.mxu0 %v352_v1 }
   0x8   :  { %12 = vsyncpa [#allocation3], 0  ;;  %302 = vmatpush3.bf16.msra.mxu1 %v325_v5  ;;  %v326_v7 = vld [vmem:[%s442_s3 + $0x8] sm:$0xff]   ;;  %v327_v8 = vld [vmem:[%s442_s3] sm:$0xff]   ;;  %vm138_vm2 = vcmask 523264   ;;  %s354_s21 = smov [#allocation2]  }
   0x9   :  { %296 = vmatmul.mubr.msk.bf16.vlgmr.msra.gmra.mxu0 %vm53_vm1, %v29_v6  ;;  %303 = vmatprep.subr.bf16.mxu1 %v352_v1  ;;  %v328_v9 = vld [vmem:[%s444_s5 + $0x8] sm:$0xff]   ;;  %v266_v10 = vld [vmem:[%s441_s2] ss:$0 sm:$0xff]  ;;  %vm250_vm3 = vcmask 80896  }
   0xa   :  { %315 = vmatprep.mubr.msk.bf16.mxu0 %vm353_vm0, %v352_v1  ;;  %312 = vmatpush3.bf16.msra.mxu0 %v328_v9  ;;  %v329_v18 = vld [vmem:[%s444_s5] sm:$0xff]   ;;  %s258_s5 = sshll.u32 %s354_s21, 4  ;;  %s259_s5 = int_to_ptr.vmem [resolvable:$true] %s258_s5 }
   0xb   :  { %313 = vmatprep.subr.bf16.mxu0 %v352_v1  ;;  %v270_v19 = vld [vmem:[%s443_s4] ss:$0 sm:$0xff]  ;;  %s330_s4 = scalar_lea.vmem %s259_s5, 128  ;;  %p335_p1 = scmp.lt.s32.totalorder %s259_s5, %s259_s5 }
   0xc   :  { %304 = vmatpush3.bf16.msra.mxu1 %v326_v7  ;;  %v276_v27 = vld [vmem:[%s445_s6] ss:$0 sm:$0xff]  ;;  %p331_p0 = scmp.ne.s32.totalorder %s259_s5, %s330_s4  ;;  %p336_p2 = scmp.lt.s32.totalorder %s330_s4, %s330_s4 }
   0xd   :  { %305 = vmatprep.subr.bf16.mxu1 %v352_v1 }
   0xe   :  { %314 = vmatpush3.bf16.msra.mxu0 %v329_v18  ;;  %p337_p3 = por %p336_p2, %p335_p1 }
  0x10   :  { %306 = vmatpush3.bf16.msra.mxu1 %v327_v8  ;;  %p338_p4 = pnand %p337_p3, %p331_p0 }
  0xc9   :  { %v91_v11 = vpop.f32.mrf.mxu0 }
  0xca   :  { %v92_v12 = vadd.f32 %v266_v10, %v91_v11 }
  0xcb   :  { %v297_v13 = vpop.f32.mrf.mxu0 }
  0xcc   :  { %v97_v14 = vmax.f32 %v92_v12, 0.0 }
  0xcd   :  { %v94_v15 = vpop.f32.mrf.mxu0 }
  0xce   :  { %v98_v16 = vpack.c.bf16 %v97_v14, %v97_v14 }
  0xcf   :  { %v298_v17 = vpop.f32.mrf.mxu0 }
  0xd0   :  { %308 = vmatmul.mubr.msk.bf16.vlgmr.msra.gmra.mxu1 %vm138_vm2, %v98_v16 }
 0x190   :  { %v176_v20 = vpop.f32.mrf.mxu1 }
 0x191   :  { %v177_v21 = vadd.f32 %v270_v19, %v176_v20 }
 0x192   :  { %v309_v22 = vpop.f32.mrf.mxu1 }
 0x193   :  { %v182_v23 = vmax.f32 %v177_v21, 0.0 }
 0x194   :  { %v179_v24 = vpop.f32.mrf.mxu1 }
 0x195   :  { %v183_v25 = vpack.c.bf16 %v182_v23, %v182_v23 }
 0x196   :  { %v310_v26 = vpop.f32.mrf.mxu1 }
 0x197   :  { %316 = vmatmul.mubr.msk.bf16.vlgmr.msra.gmra.mxu0 %vm53_vm1, %v183_v25 }
 0x257   :  { %v244_v28 = vpop.f32.mrf.mxu0 }
 0x258   :  { %v245_v29 = vadd.f32 %v276_v27, %v244_v28 }
 0x259   :  { %v317_v30 = vpop.f32.mrf.mxu0 }
 0x25a   :  { %251 = vst.msk [vmem:[#allocation2] sm:$0xff] %vm250_vm3, %v245_v29 }
 0x25b   :  { %v247_v31 = vpop.f32.mrf.mxu0 }
 0x25c   :  { %341 = shalt.err (!%p338_p4)
}
 0x25d   :  { %261 = dma.vmem_to_hbm [thread:$0]  %s259_s5, 128, %s446_s7, [#allocation3]   ;;  %v318_v32 = vpop.f32.mrf.mxu0 }
 0x25e   :  { %350 = dma.done.wait [#allocation3], 128  }
 0x25f   :  { %351 = vsyncadd [#allocation3], 4294967168 }
 0x260   :  { %265 = vsyncpa [#allocation3], 1 }

</bundles_post_ra>
